<compile_context>
chip_gen: v6e
topology: v6e:2x2x1
jax: 0.10.0
libtpu: 0.0.40
codegen_flags: <defaults>
</compile_context>

<pallas_src>
import functools

import jax
import jax.numpy as jnp
from jax.experimental import pallas as pl
from jax.experimental.pallas import tpu as pltpu

_LANE = 128
_SUBLANE = 8


def _leaky_relu(v, slope=0.2):
    return jnp.where(v > 0, v, slope * v)


def _round_up(a, m):
    return (a + m - 1) // m * m


# --------------------------------------------------------------------------
# One-time parameter preparation (hoisted out of the per-call hot path).
# --------------------------------------------------------------------------
def prepare_params(w1, b1, w2, b2, wr, br, *, compute_dtype=None):
    """Pad to lane-dense widths and fuse W1 ++ Wr once.

    w*: [in, out] (pre-transposed from PyTorch's [out, in]); b*: [out] or [1, out].
    compute_dtype: optional MXU operand dtype for the weights (e.g. jnp.bfloat16
    on v5e/v6e); biases stay f32 (they are added after f32 accumulation).
    """
    w1, w2, wr = map(jnp.asarray, (w1, w2, wr))
    b1, b2, br = (jnp.asarray(b).reshape(1, -1) for b in (b1, b2, br))

    input_dim, latent = w1.shape
    assert wr.shape == (input_dim, latent), "wr must be [input_dim, latent]"
    assert w2.shape == (latent, latent), "w2 must be [latent, latent]"
    assert b1.shape[1] == latent and b2.shape[1] == latent and br.shape[1] == latent

    latent_p = pl.cdiv(latent, _LANE) * _LANE

    def pad_cols(a):
        return jnp.pad(a, ((0, 0), (0, latent_p - a.shape[1])))

    w1r = jnp.concatenate([pad_cols(w1), pad_cols(wr)], axis=1)   # [in, 2*latent_p]
    b1r = jnp.concatenate([pad_cols(b1), pad_cols(br)], axis=1)   # [1,  2*latent_p]
    w2p = jnp.pad(w2, ((0, latent_p - latent), (0, latent_p - latent)))
    b2p = pad_cols(b2)

    if compute_dtype is not None:
        w1r = w1r.astype(compute_dtype)
        w2p = w2p.astype(compute_dtype)
    b1r = b1r.astype(jnp.float32)
    b2p = b2p.astype(jnp.float32)

    return {
        "w1r": w1r, "b1r": b1r, "w2": w2p, "b2": b2p,
        "input_dim": input_dim, "latent": latent, "latent_p": latent_p,
    }


# --------------------------------------------------------------------------
# Kernel
# --------------------------------------------------------------------------
def _residual_linear_kernel(x_ref, w1r_ref, b1r_ref, w2_ref, b2_ref, o_ref,
                            *, latent_p):
    cdt = w1r_ref.dtype                       # MXU operand dtype (params decide)
    x = x_ref[...].astype(cdt)

    # Fused x-side matmul: [tb, in] @ [in, 2*latent_p] (W1 ++ Wr), f32 accum.
    xb = jnp.dot(x, w1r_ref[...],
                 preferred_element_type=jnp.float32) + b1r_ref[...].astype(jnp.float32)

    h = _leaky_relu(xb[:, :latent_p])         # fc branch hidden (f32)
    res = xb[:, latent_p:]                    # residual branch (f32)

    out = jnp.dot(h.astype(cdt), w2_ref[...],
                  preferred_element_type=jnp.float32) + b2_ref[...].astype(jnp.float32)

    o_ref[...] = _leaky_relu(out + res).astype(o_ref.dtype)  # single downcast


# --------------------------------------------------------------------------
# VMEM-aware tiling
# --------------------------------------------------------------------------
def _vmem_capacity_bytes():
    try:
        return int(pltpu.get_tpu_info().vmem_capacity_bytes)
    except Exception:
        return 64 * 1024 * 1024   # v7x per-core VMEM — smallest of v5e/v6e/v7x


def _tile_and_vmem(B, input_dim, latent_p, x_itemsize, out_itemsize,
                   weight_arrays, tile_b):
    cap = _vmem_capacity_bytes()
    budget = int(cap * 0.6)                   # headroom for compiler scratch

    # Resident weights/biases, conservatively counted as double-buffered.
    weight_bytes = 2 * sum(a.size * a.dtype.itemsize for a in weight_arrays)

    # Per batch row: double-buffered x and out tiles + f32 intermediates
    # (xb [2*latent_p], h / res / out / y views ~4*latent_p f32).
    per_row = (2 * input_dim * x_itemsize
               + 2 * latent_p * out_itemsize
               + 24 * latent_p)

    avail = max(budget - weight_bytes, 8 * per_row)
    tb_cap = max(_SUBLANE, (avail // per_row) // _SUBLANE * _SUBLANE)
    tb = min(tile_b, tb_cap, _round_up(B, _SUBLANE))

    # Give the second v7x TensorCore work when the batch allows it.
    if B >= 2 * _SUBLANE and pl.cdiv(B, tb) < 2:
        tb = max(_SUBLANE, _round_up(pl.cdiv(B, 2), _SUBLANE))

    need = weight_bytes + tb * per_row + (1 << 20)
    vmem_limit = int(min(cap * 0.9, max(32 * 1024 * 1024, 2 * need)))
    return tb, vmem_limit


# --------------------------------------------------------------------------
# Hot-path wrapper
# --------------------------------------------------------------------------
def residual_linear(x, params, *, tile_b=512, resident_buffer_count=None):
    """x: [B, input_dim]; params: output of prepare_params(). Returns [B, latent]."""
    w1r, b1r, w2p, b2p = params["w1r"], params["b1r"], params["w2"], params["b2"]
    latent, latent_p = params["latent"], params["latent_p"]
    B, input_dim = x.shape
    assert input_dim == params["input_dim"], "input_dim mismatch vs prepared params"

    tb, vmem_limit = _tile_and_vmem(
        B, input_dim, latent_p,
        x.dtype.itemsize, x.dtype.itemsize,
        (w1r, b1r, w2p, b2p), tile_b)
    grid = (pl.cdiv(B, tb),)                  # partial last block masked by Pallas

    flops = 2 * B * (input_dim * 2 * latent_p + latent_p * latent_p)
    bytes_accessed = (
        x.size * x.dtype.itemsize
        + sum(a.size * a.dtype.itemsize for a in (w1r, b1r, w2p, b2p))
        + B * latent_p * x.dtype.itemsize)

    # Optional single-buffering of the resident (constant index_map) operands.
    resident_kw = {}
    if resident_buffer_count is not None and resident_buffer_count != 2:
        resident_kw["pipeline_mode"] = pl.Buffered(resident_buffer_count)

    out_p = pl.pallas_call(
        functools.partial(_residual_linear_kernel, latent_p=latent_p),
        out_shape=jax.ShapeDtypeStruct((B, latent_p), x.dtype),
        grid=grid,
        in_specs=[
            pl.BlockSpec((tb, input_dim), lambda i: (i, 0)),           # x tile
            pl.BlockSpec(w1r.shape, lambda i: (0, 0), **resident_kw),  # resident
            pl.BlockSpec(b1r.shape, lambda i: (0, 0), **resident_kw),
            pl.BlockSpec(w2p.shape, lambda i: (0, 0), **resident_kw),
            pl.BlockSpec(b2p.shape, lambda i: (0, 0), **resident_kw),
        ],
        out_specs=pl.BlockSpec((tb, latent_p), lambda i: (i, 0)),
        compiler_params=pltpu.CompilerParams(
            dimension_semantics=("parallel",),
            vmem_limit_bytes=vmem_limit),
        cost_estimate=pl.CostEstimate(
            flops=flops, transcendentals=0, bytes_accessed=bytes_accessed),
    )(x, w1r, b1r, w2p, b2p)

    # Only the feature axis may need un-padding (no batch slice needed).
    return out_p if latent == latent_p else out_p[:, :latent]


# --------------------------------------------------------------------------
# Pure-JAX reference + demo
# --------------------------------------------------------------------------
def reference(x, w1, b1, w2, b2, wr, br):
    h = x @ w1 + b1
    h = jnp.where(h > 0, h, 0.2 * h)
    out = h @ w2 + b2
    res = x @ wr + br
    y = out + res
    return jnp.where(y > 0, y, 0.2 * y)


if __name__ == "__main__":
    key = jax.random.PRNGKey(0)
    batch, input_dim, latent_dim = 8, 32, 32

    ks = jax.random.split(key, 7)
    x = jax.random.normal(ks[0], (batch, input_dim), dtype=jnp.float32)

    # Deterministic synthetic parameters (PyTorch Linear-ish scale).
    def init_w(k, fan_in, fan_out):
        bound = 1.0 / jnp.sqrt(jnp.float32(fan_in))
        return jax.random.uniform(k, (fan_in, fan_out), jnp.float32, -bound, bound)

    def init_b(k, fan_in, fan_out):
        bound = 1.0 / jnp.sqrt(jnp.float32(fan_in))
        return jax.random.uniform(k, (fan_out,), jnp.float32, -bound, bound)

    w1 = init_w(ks[1], input_dim, latent_dim)
    b1 = init_b(ks[2], input_dim, latent_dim)
    w2 = init_w(ks[3], latent_dim, latent_dim)
    b2 = init_b(ks[4], latent_dim, latent_dim)
    wr = init_w(ks[5], input_dim, latent_dim)
    br = init_b(ks[6], input_dim, latent_dim)

    # Pad/fuse the parameters ONCE (module-init time), not per forward call.
    # For bf16 MXU operands on v5e/v6e, pass compute_dtype=jnp.bfloat16 here
    # (relax the tolerance accordingly); the demo stays f32.
    params = prepare_params(w1, b1, w2, b2, wr, br)
    params = jax.tree_util.tree_map(
        lambda a: jax.block_until_ready(a) if isinstance(a, jax.Array) else a, params)

    y = residual_linear(x, params)
    jax.block_until_ready(y)

    y_ref = reference(x, w1, b1.reshape(1, -1), w2, b2.reshape(1, -1),
                      wr, br.reshape(1, -1))
    assert y.shape == y_ref.shape, "shape mismatch vs reference"
    assert jnp.allclose(y, y_ref, atol=1e-5, rtol=1e-5), "mismatch vs reference"

    print("KERNEL_OK")
</pallas_src>

<mosaic_0001>
module attributes {stable_mosaic.version = 11 : i64} {
  func.func @_residual_linear_kernel(%arg0: i32, %arg1: memref<8x32xf32, #tpu.memory_space<vmem>>, %arg2: memref<32x256xf32, #tpu.memory_space<vmem>>, %arg3: memref<1x256xf32, #tpu.memory_space<vmem>>, %arg4: memref<128x128xf32, #tpu.memory_space<vmem>>, %arg5: memref<1x128xf32, #tpu.memory_space<vmem>>, %arg6: memref<8x128xf32, #tpu.memory_space<vmem>>) attributes {dimension_semantics = [#tpu.dimension_semantics<parallel>], iteration_bounds = array<i64: 1>, scalar_prefetch = 0 : i64, scratch_operands = 0 : i64, tpu.core_type = #tpu.core_type<tc>, window_params = [{transform_indices = @transform_0, window_bounds = array<i64: 8, 32>}, {pipeline_mode = #tpu.pipeline_mode<synchronous>, transform_indices = @transform_1, window_bounds = array<i64: 32, 256>}, {pipeline_mode = #tpu.pipeline_mode<synchronous>, transform_indices = @transform_2, window_bounds = array<i64: 1, 256>}, {pipeline_mode = #tpu.pipeline_mode<synchronous>, transform_indices = @transform_3, window_bounds = array<i64: 128, 128>}, {pipeline_mode = #tpu.pipeline_mode<synchronous>, transform_indices = @transform_4, window_bounds = array<i64: 1, 128>}, {transform_indices = @transform_5, window_bounds = array<i64: 8, 128>}]} {
    %c0 = arith.constant 0 : index
    %c0_0 = arith.constant 0 : index
    %0 = vector.load %arg1[%c0, %c0_0] : memref<8x32xf32, #tpu.memory_space<vmem>>, vector<8x32xf32>
    %c0_1 = arith.constant 0 : index
    %c0_2 = arith.constant 0 : index
    %1 = vector.load %arg2[%c0_1, %c0_2] : memref<32x256xf32, #tpu.memory_space<vmem>>, vector<32x256xf32>
    %cst = arith.constant dense<0.000000e+00> : vector<8x256xf32>
    %2 = tpu.matmul %0, %1, %cst {dimension_numbers = #tpu.dot_dimension_numbers<[1], [0], [0], [1], [0, 0, 1, 1], [], []>} : vector<8x32xf32>, vector<32x256xf32>, vector<8x256xf32> -> vector<8x256xf32>
    %c0_3 = arith.constant 0 : index
    %c0_4 = arith.constant 0 : index
    %3 = vector.load %arg3[%c0_3, %c0_4] : memref<1x256xf32, #tpu.memory_space<vmem>>, vector<1x256xf32>
    %4 = vector.broadcast %3 : vector<1x256xf32> to vector<8x256xf32>
    %5 = arith.addf %2, %4 : vector<8x256xf32>
    %6 = vector.extract_strided_slice %5 {offsets = [0, 0], sizes = [8, 128], strides = [1, 1]} : vector<8x256xf32> to vector<8x128xf32>
    %cst_5 = arith.constant 0.000000e+00 : f32
    %7 = vector.broadcast %cst_5 : f32 to vector<8x128xf32>
    %8 = arith.cmpf ogt, %6, %7 : vector<8x128xf32>
    %cst_6 = arith.constant 2.000000e-01 : f32
    %9 = vector.broadcast %cst_6 : f32 to vector<8x128xf32>
    %10 = arith.mulf %9, %6 : vector<8x128xf32>
    %11 = arith.select %8, %6, %10 : vector<8x128xi1>, vector<8x128xf32>
    %12 = vector.extract_strided_slice %5 {offsets = [0, 128], sizes = [8, 128], strides = [1, 1]} : vector<8x256xf32> to vector<8x128xf32>
    %c0_7 = arith.constant 0 : index
    %c0_8 = arith.constant 0 : index
    %13 = vector.load %arg4[%c0_7, %c0_8] : memref<128x128xf32, #tpu.memory_space<vmem>>, vector<128x128xf32>
    %cst_9 = arith.constant dense<0.000000e+00> : vector<8x128xf32>
    %14 = tpu.matmul %11, %13, %cst_9 {dimension_numbers = #tpu.dot_dimension_numbers<[1], [0], [0], [1], [0, 0, 1, 1], [], []>} : vector<8x128xf32>, vector<128x128xf32>, vector<8x128xf32> -> vector<8x128xf32>
    %c0_10 = arith.constant 0 : index
    %c0_11 = arith.constant 0 : index
    %15 = vector.load %arg5[%c0_10, %c0_11] : memref<1x128xf32, #tpu.memory_space<vmem>>, vector<1x128xf32>
    %16 = vector.broadcast %15 : vector<1x128xf32> to vector<8x128xf32>
    %17 = arith.addf %14, %16 : vector<8x128xf32>
    %18 = arith.addf %17, %12 : vector<8x128xf32>
    %cst_12 = arith.constant 0.000000e+00 : f32
    %19 = vector.broadcast %cst_12 : f32 to vector<8x128xf32>
    %20 = arith.cmpf ogt, %18, %19 : vector<8x128xf32>
    %cst_13 = arith.constant 2.000000e-01 : f32
    %21 = vector.broadcast %cst_13 : f32 to vector<8x128xf32>
    %22 = arith.mulf %21, %18 : vector<8x128xf32>
    %23 = arith.select %20, %18, %22 : vector<8x128xi1>, vector<8x128xf32>
    %c0_14 = arith.constant 0 : index
    %c0_15 = arith.constant 0 : index
    %24 = vector.load %arg6[%c0_14, %c0_15] : memref<8x128xf32, #tpu.memory_space<vmem>>, vector<8x128xf32>
    tpu.vector_store %arg6[%c0_14, %c0_15], %23 {strides = array<i32>} : memref<8x128xf32, #tpu.memory_space<vmem>>, vector<8x128xf32>,
    return
  }
  func.func @transform_0(%arg0: i32) -> (i32, i32) {
    %c0_i32 = arith.constant 0 : i32
    %c0_i32_0 = arith.constant 0 : i32
    return %arg0, %c0_i32 : i32, i32
  }
  func.func @transform_1(%arg0: i32) -> (i32, i32) {
    %c0_i32 = arith.constant 0 : i32
    %c0_i32_0 = arith.constant 0 : i32
    %c0_i32_1 = arith.constant 0 : i32
    return %c0_i32, %c0_i32_0 : i32, i32
  }
  func.func @transform_2(%arg0: i32) -> (i32, i32) {
    %c0_i32 = arith.constant 0 : i32
    %c0_i32_0 = arith.constant 0 : i32
    %c0_i32_1 = arith.constant 0 : i32
    return %c0_i32, %c0_i32_0 : i32, i32
  }
  func.func @transform_3(%arg0: i32) -> (i32, i32) {
    %c0_i32 = arith.constant 0 : i32
    %c0_i32_0 = arith.constant 0 : i32
    %c0_i32_1 = arith.constant 0 : i32
    return %c0_i32, %c0_i32_0 : i32, i32
  }
  func.func @transform_4(%arg0: i32) -> (i32, i32) {
    %c0_i32 = arith.constant 0 : i32
    %c0_i32_0 = arith.constant 0 : i32
    %c0_i32_1 = arith.constant 0 : i32
    return %c0_i32, %c0_i32_0 : i32, i32
  }
  func.func @transform_5(%arg0: i32) -> (i32, i32) {
    %c0_i32 = arith.constant 0 : i32
    %c0_i32_0 = arith.constant 0 : i32
    return %arg0, %c0_i32 : i32, i32
  }
}

</mosaic_0001>

<bundles_post_ra>
// kernel: tpu_custom_call.1
= control target key start
LH: loop header
LB: loop body
LE: loop exit
PB: predicated region body
PF: predicated region fallthrough
CT: control target
= control target key end

     0   :  { %10 = vsyncpa [#allocation3], 0  ;;  %s499_s0 = inlined_call_operand.hbm [shape: f32[8,32], index: 0, kind: input, shape index: {}]   ;;  %s500_s1 = inlined_call_operand.hbm [shape: f32[32,256], index: 1, kind: input, shape index: {}]   ;;  %s501_s2 = inlined_call_operand.vmem [shape: f32[1,256], index: 2, kind: input, shape index: {}]   ;;  %s502_s3 = inlined_call_operand.hbm [shape: f32[128,128], index: 3, kind: input, shape index: {}]   ;;  %s503_s4 = inlined_call_operand.vmem [shape: f32[1,128], index: 4, kind: input, shape index: {}]   ;;  %s504_s5 = inlined_call_operand.hbm [shape: f32[8,128], index: 5, kind: output, shape index: {}]  }
   0x1   :  { %11 = vsyncpa [#allocation6], 0 }
   0x2   :  { %12 = vsyncpa [#allocation4], 0  ;;  %s423_s18 = smov [#allocation5]  }
   0x3   :  { %s28_s19 = sshll.u32 %s423_s18, 4  ;;  %s29_s19 = int_to_ptr.vmem [resolvable:$true] %s28_s19 }
   0x4   :  { %s345_s20 = scalar_lea.vmem %s29_s19, 1024  ;;  %p350_p1 = scmp.lt.s32.totalorder %s29_s19, %s29_s19 }
   0x5   :  { %p346_p0 = scmp.ne.s32.totalorder %s29_s19, %s345_s20  ;;  %p351_p2 = scmp.lt.s32.totalorder %s345_s20, %s345_s20 }
   0x7   :  { %p352_p3 = por %p351_p2, %p350_p1 }
   0x9   :  { %p353_p4 = pnand %p352_p3, %p346_p0 }
   0xb   :  { %356 = shalt.err (!%p353_p4)
}
   0xc   :  { %s424_s21 = smov 256   ;;  %s425_s22 = smov 16  }
   0xd   :  { %34 = dma.hbm_to_vmem [thread:$0]  %s500_s1, 1024, %s29_s19, [#allocation6], %s424_s21, %s424_s21, %s425_s22  }
   0xe   :  { %s426_s25 = smov [#allocation2]   ;;  %s427_s27 = smov [#allocation7]  }
   0xf   :  { %s19_s26 = sshll.u32 %s426_s25, 4  ;;  %s42_s28 = sshll.u32 %s427_s27, 4  ;;  %s20_s26 = int_to_ptr.vmem [resolvable:$true] %s19_s26  ;;  %s43_s28 = int_to_ptr.vmem [resolvable:$true] %s42_s28 }
  0x10   :  { %s365_s29 = scalar_lea.vmem %s20_s26, 128  ;;  %p370_p6 = scmp.lt.s32.totalorder %s20_s26, %s20_s26 }
  0x11   :  { %p366_p5 = scmp.ne.s32.totalorder %s20_s26, %s365_s29  ;;  %p371_p7 = scmp.lt.s32.totalorder %s365_s29, %s365_s29 }
  0x13   :  { %p372_p8 = por %p371_p7, %p370_p6 }
  0x15   :  { %p373_p9 = pnand %p372_p8, %p366_p5 }
  0x17   :  { %376 = shalt.err (!%p373_p9)
}
  0x18   :  { %22 = dma.hbm_to_vmem [thread:$0]  %s499_s0, 128, %s20_s26, [#allocation3]  }
  0x19   :  { %s385_s7 = scalar_lea.vmem %s43_s28, 2048  ;;  %p390_p11 = scmp.lt.s32.totalorder %s43_s28, %s43_s28 }
  0x1a   :  { %p386_p10 = scmp.ne.s32.totalorder %s43_s28, %s385_s7  ;;  %p391_p12 = scmp.lt.s32.totalorder %s385_s7, %s385_s7 }
  0x1c   :  { %p392_p13 = por %p391_p12, %p390_p11 }
  0x1e   :  { %p393_p0 = pnand %p392_p13, %p386_p10 }
  0x20   :  { %396 = shalt.err (!%p393_p0)
}
  0x21   :  { %s428_s1 = smov 128   ;;  %s429_s8 = smov 8  }
  0x22   :  { %48 = dma.hbm_to_vmem [thread:$0]  %s502_s3, 2048, %s43_s28, [#allocation6], %s428_s1, %s428_s1, %s429_s8  }
  0x23   :  { %417 = dma.done.wait [#allocation3], 128  }
  0x24   :  { %418 = vsyncadd [#allocation3], 4294967168 }
  0x25   :  { %419 = dma.done.wait [#allocation6], 3072  }
  0x26   :  { %420 = vsyncadd [#allocation6], 4294964224  ;;  %v430_v0 = vmov 0.0   ;;  %v68_v1 = vld [vmem:[#allocation5 + $0x38] sm:$0xff]  ;;  %v67_v2 = vld [vmem:[#allocation5 + $0x30] sm:$0xff]  ;;  %vm81_vm0 = vcmask 261120   ;;  %v71_v26 = vlaneseq }
  0x27   :  { %149 = vmatprep.mubr.f32.mxu0 %v430_v0  ;;  %292 = vmatprep.subr.mxu1 %v430_v0  ;;  %v66_v3 = vld [vmem:[#allocation5 + $0x28] sm:$0xff]  ;;  %v65_v4 = vld [vmem:[#allocation5 + $0x20] sm:$0xff]  ;;  %v64_v5 = vld [vmem:[#allocation5 + $0x18] sm:$0xff]  ;;  %vm431_vm1 = vmmov 0  }
  0x28   :  { %109 = vmatprep.subr.mxu0 %v68_v1  ;;  %v63_v6 = vld [vmem:[#allocation5 + $0x10] sm:$0xff]  ;;  %v174_v7 = vld [vmem:[#allocation7 + $0x78] sm:$0xff]  ;;  %v62_v9 = vld [vmem:[#allocation5 + $0x8] sm:$0xff]  ;;  %324 = vmatprep.mubr.msk.f32.mxu1 %vm431_vm1, %v430_v0  ;;  %v72_v27 = vshrl.u32 %v71_v26, 7 }
  0x29   :  { %110 = vmatpush1.msra.mxu0 %v67_v2  ;;  %v173_v8 = vld [vmem:[#allocation7 + $0x70] sm:$0xff]  ;;  %293 = vmatpush3.msra.mxu1 %v174_v7  ;;  %v61_v10 = vld [vmem:[#allocation5] sm:$0xff]  ;;  %v172_v11 = vld [vmem:[#allocation7 + $0x68] sm:$0xff] }
  0x2a   :  { %111 = vmatprep.subr.mxu0 %v66_v3  ;;  %294 = vmatprep.subr.mxu1 %v430_v0  ;;  %v60_v12 = vld [vmem:[#allocation2] sm:$0xff]  ;;  %v171_v13 = vld [vmem:[#allocation7 + $0x60] sm:$0xff]  ;;  %v169_v15 = vld [vmem:[#allocation7 + $0x50] sm:$0xff]  ;;  %v73_v28 = vsub.s32 0, %v72_v27  ;;  %v77_v35 = vsub.s32 1, %v72_v27 }
  0x2b   :  { %112 = vmatpush1.msra.mxu0 %v65_v4  ;;  %295 = vmatpush3.msra.mxu1 %v173_v8  ;;  %v170_v14 = vld [vmem:[#allocation7 + $0x58] sm:$0xff]  ;;  %v168_v16 = vld [vmem:[#allocation7 + $0x48] sm:$0xff]  ;;  %v167_v17 = vld [vmem:[#allocation7 + $0x40] sm:$0xff] }
  0x2c   :  { %113 = vmatprep.subr.mxu0 %v64_v5  ;;  %296 = vmatprep.subr.mxu1 %v430_v0  ;;  %v166_v18 = vld [vmem:[#allocation7 + $0x38] sm:$0xff]  ;;  %v165_v19 = vld [vmem:[#allocation7 + $0x30] sm:$0xff]  ;;  %v164_v20 = vld [vmem:[#allocation7 + $0x28] sm:$0xff] }
  0x2d   :  { %114 = vmatpush1.msra.mxu0 %v63_v6  ;;  %297 = vmatpush3.msra.mxu1 %v172_v11  ;;  %v163_v21 = vld [vmem:[#allocation7 + $0x20] sm:$0xff]  ;;  %v162_v22 = vld [vmem:[#allocation7 + $0x18] sm:$0xff]  ;;  %v161_v23 = vld [vmem:[#allocation7 + $0x10] sm:$0xff] }
  0x2e   :  { %115 = vmatprep.subr.mxu0 %v62_v9  ;;  %298 = vmatprep.subr.mxu1 %v430_v0  ;;  %v160_v24 = vld [vmem:[#allocation7 + $0x8] sm:$0xff]  ;;  %v159_v25 = vld [vmem:[#allocation7] sm:$0xff]  ;;  %v69_v29 = vld [vmem:[%s501_s2] sm:$0x3]  ;;  %s432_s2 = smov [#allocation8]  }
  0x2f   :  { %116 = vmatpush1.msra.mxu0 %v61_v10  ;;  %299 = vmatpush3.msra.mxu1 %v171_v13  ;;  %v74_v30 = vrot.slane %v69_v29, %v73_v28  ;;  %v78_v36 = vrot.slane %v69_v29, %v77_v35  ;;  %v274_v38 = vld [vmem:[%s503_s4] ss:$0 sm:$0xff]  ;;  %s263_s13 = sshll.u32 %s432_s2, 4  ;;  %s264_s13 = int_to_ptr.vmem [resolvable:$true] %s263_s13 }
  0x30   :  { %273 = vmatmul.mubr.msk.f32.vlgmr.msra.gmra.mxu0 %vm81_vm0, %v60_v12  ;;  %300 = vmatprep.subr.mxu1 %v430_v0  ;;  %s397_s14 = scalar_lea.vmem %s264_s13, 128  ;;  %p402_p2 = scmp.lt.s32.totalorder %s264_s13, %s264_s13 }
  0x31   :  { %301 = vmatpush3.msra.mxu1 %v170_v14  ;;  %p398_p1 = scmp.ne.s32.totalorder %s264_s13, %s397_s14  ;;  %p403_p3 = scmp.lt.s32.totalorder %s397_s14, %s397_s14 }
  0x32   :  { %302 = vmatprep.subr.mxu1 %v430_v0 }
  0x33   :  { %303 = vmatpush3.msra.mxu1 %v169_v15  ;;  %p404_p4 = por %p403_p3, %p402_p2 }
  0x34   :  { %304 = vmatprep.subr.mxu1 %v430_v0 }
  0x35   :  { %305 = vmatpush3.msra.mxu1 %v168_v16  ;;  %p405_p5 = pnand %p404_p4, %p398_p1 }
  0x36   :  { %306 = vmatprep.subr.mxu1 %v430_v0 }
  0x37   :  { %307 = vmatpush3.msra.mxu1 %v167_v17 }
  0x38   :  { %308 = vmatprep.subr.mxu1 %v430_v0 }
  0x39   :  { %309 = vmatpush3.msra.mxu1 %v166_v18 }
  0x3a   :  { %310 = vmatprep.subr.mxu1 %v430_v0 }
  0x3b   :  { %311 = vmatpush3.msra.mxu1 %v165_v19 }
  0x3c   :  { %312 = vmatprep.subr.mxu1 %v430_v0 }
  0x3d   :  { %313 = vmatpush3.msra.mxu1 %v164_v20 }
  0x3e   :  { %314 = vmatprep.subr.mxu1 %v430_v0 }
  0x3f   :  { %315 = vmatpush3.msra.mxu1 %v163_v21 }
  0x40   :  { %316 = vmatprep.subr.mxu1 %v430_v0 }
  0x41   :  { %317 = vmatpush3.msra.mxu1 %v162_v22 }
  0x42   :  { %318 = vmatprep.subr.mxu1 %v430_v0 }
  0x43   :  { %319 = vmatpush3.msra.mxu1 %v161_v23 }
  0x44   :  { %320 = vmatprep.subr.mxu1 %v430_v0 }
  0x45   :  { %321 = vmatpush3.msra.mxu1 %v160_v24 }
  0x46   :  { %322 = vmatprep.subr.mxu1 %v430_v0 }
  0x47   :  { %323 = vmatpush3.msra.mxu1 %v159_v25 }
  0xf0   :  { %v151_v31 = vpop.f32.mrf.mxu0 }
  0xf1   :  { %v152_v32 = vadd.f32 %v151_v31, %v74_v30 }
  0xf2   :  { %v153_v37 = vpop.f32.mrf.mxu0 }
  0xf3   :  { %v157_v33 = vmul.f32 0.2, %v152_v32  ;;  %vm156_vm2 = vcmp.gt.f32.partialorder %v152_v32, 0.0  ;;  %v154_v40 = vadd.f32 %v153_v37, %v78_v36 }
  0xf5   :  { %v158_v34 = vsel %vm156_vm2, %v152_v32, %v157_v33 }
  0xf6   :  { %325 = vmatmul.mubr.f32.vlgmr.msra.gmra.mxu1 %v158_v34 }
 0x1b6   :  { %v248_v39 = vpop.f32.mrf.mxu1 }
 0x1b7   :  { %v249_v41 = vadd.f32 %v274_v38, %v248_v39 }
 0x1b8   :  { %v326_v42 = vpop.f32.mrf.mxu1 }
 0x1b9   :  { %v252_v43 = vadd.f32 %v249_v41, %v154_v40 }
 0x1bb   :  { %v254_v44 = vmul.f32 0.2, %v252_v43  ;;  %vm253_vm3 = vcmp.gt.f32.partialorder %v252_v43, 0.0 }
 0x1bd   :  { %v255_v45 = vsel %vm253_vm3, %v252_v43, %v254_v44 }
 0x1be   :  { %256 = vst [vmem:[#allocation8] sm:$0xff] %v255_v45 }
 0x1bf   :  { %408 = shalt.err (!%p405_p5)
}
 0x1c0   :  { %266 = dma.vmem_to_hbm [thread:$0]  %s264_s13, 128, %s504_s5, [#allocation4]  }
 0x1c1   :  { %421 = dma.done.wait [#allocation4], 128  }
 0x1c2   :  { %422 = vsyncadd [#allocation4], 4294967168 }
 0x1c3   :  { %270 = vsyncpa [#allocation3], 1 }
 0x1c4   :  { %271 = vsyncpa [#allocation6], 1 }
 0x1c5   :  { %272 = vsyncpa [#allocation4], 1 }

</bundles_post_ra>
